<compile_context>
chip_gen: v7x
topology: tpu7x:2x2x1
jax: 0.10.0
libtpu: 0.0.40
codegen_flags: <defaults>
</compile_context>

<pallas_src>
import jax
import jax.numpy as jnp
from jax.experimental import pallas as pl
from jax.experimental.pallas import tpu as pltpu


# ----------------------------------------------------------------------------
# Fused Pallas kernel: all GraphConv layers + tanh for one graph of the batch
# ----------------------------------------------------------------------------
def _gcn_fused_kernel(adj_ref, x_ref, r_src_ref, r_dst_ref, *rest):
    """rest = (w_0_ref, ..., w_{L-1}_ref, out_ref).

    Per-graph block view:
      adj_ref:   (N, N)          bf16, adj[dst, src]
      x_ref:     (N, F0)         f32
      r_src_ref: (N, 1)          f32  rsqrt(clamp(out_degree, 1))  (source side)
      r_dst_ref: (N, 1)          f32  rsqrt(clamp(in_degree, 1))   (dest side)
      w_l_ref:   (F_l, F_{l+1})  bf16
      out_ref:   (N, F_L)        f32
    """
    *w_refs, out_ref = rest

    adj = adj_ref[...]                      # bf16, stays bf16 for the MXU
    r_src = r_src_ref[...]                  # f32
    r_dst = r_dst_ref[...]                  # f32
    h = x_ref[...]                          # f32

    for w_ref in w_refs:                    # static Python layer loop
        w = w_ref[...]                      # bf16
        f_in, f_out = w.shape
        if f_in <= f_out:
            # Narrow -> wide: aggregate first so the N^2 matmul contracts F_in.
            hs = h * r_src                                          # f32 VPU
            agg = jnp.dot(adj, hs.astype(jnp.bfloat16),
                          preferred_element_type=jnp.float32)       # MXU bf16
            agg = agg * r_dst                                       # f32 VPU
            z = jnp.dot(agg.astype(jnp.bfloat16), w,
                        preferred_element_type=jnp.float32)         # MXU bf16
        else:
            # Wide -> narrow: project first so the N^2 matmul contracts F_out.
            hp = jnp.dot(h.astype(jnp.bfloat16), w,
                         preferred_element_type=jnp.float32)        # MXU bf16
            hs = hp * r_src
            agg = jnp.dot(adj, hs.astype(jnp.bfloat16),
                          preferred_element_type=jnp.float32)       # MXU bf16
            z = agg * r_dst
        h = jnp.tanh(z)                     # f32 EUP (dropout p=0 omitted)

    out_ref[...] = h


# ----------------------------------------------------------------------------
# Wrapper: single pallas_call, batch grid axis, per-graph blocks in VMEM
# ----------------------------------------------------------------------------
def gcn_forward(adj, x, weights):
    """adj: (B, N, N) f32 dense adjacency (adj[b, dst, src]); x: (B, N, F0) f32;
    weights: list of (F_l, F_{l+1}) f32 GraphConv weights (shared across the
    batch).  Returns (B, N, F_L) f32."""
    B, N, _ = adj.shape
    f_in0 = x.shape[-1]
    f_out = weights[-1].shape[1]

    # --- DGL GraphConv norm='both' degree normalization (clamp(min=1)) -------
    in_deg = jnp.maximum(jnp.sum(adj, axis=2), 1.0)      # (B, N) dest in-degrees
    out_deg = jnp.maximum(jnp.sum(adj, axis=1), 1.0)     # (B, N) src out-degrees
    r_dst = jax.lax.rsqrt(in_deg)[..., None]             # (B, N, 1)
    r_src = jax.lax.rsqrt(out_deg)[..., None]            # (B, N, 1)

    # bf16 for the MXU: 0/1 adjacency entries are exact in bf16; weight cast
    # changes numerics by <0.4% relative (accumulation stays f32).
    adj_bf16 = adj.astype(jnp.bfloat16)
    weights_bf16 = [w.astype(jnp.bfloat16) for w in weights]

    # --- Advisory cost estimate ----------------------------------------------
    flops = 0
    transcendentals = 0
    for w in weights:
        fi, fo = w.shape
        flops += B * (2 * N * N * min(fi, fo) + 2 * N * fi * fo)
        transcendentals += B * N * fo
    bytes_accessed = (2 * adj_bf16.size + 4 * x.size
                      + 4 * (r_src.size + r_dst.size)
                      + sum(2 * w.size for w in weights)
                      + 4 * B * N * f_out)

    # --- VMEM limit sized from the resident buffers (not the scoped default) -
    f_max = max([f_in0] + [w.shape[1] for w in weights])
    per_block_bytes = (
        2 * (2 * N * N)                       # adj block bf16, double-buffered
        + 2 * (4 * N * f_in0)                 # x block f32, double-buffered
        + 4 * (4 * N)                         # degree vectors
        + sum(2 * w.size for w in weights)    # bf16 weights (resident)
        + 2 * (4 * N * f_out)                 # output block, double-buffered
        + 4 * (4 * N * f_max)                 # f32 intermediates headroom
    )
    vmem_limit = int(min(64 * 1024 * 1024,
                         max(32 * 1024 * 1024, 2 * per_block_bytes)))

    in_specs = [
        pl.BlockSpec((None, N, N), lambda b: (b, 0, 0)),        # adj (per graph)
        pl.BlockSpec((None, N, f_in0), lambda b: (b, 0, 0)),    # x
        pl.BlockSpec((None, N, 1), lambda b: (b, 0, 0)),        # r_src
        pl.BlockSpec((None, N, 1), lambda b: (b, 0, 0)),        # r_dst
    ] + [pl.BlockSpec(w.shape, lambda b: (0, 0)) for w in weights]  # resident W

    grid_spec = pltpu.PrefetchScalarGridSpec(
        num_scalar_prefetch=0,
        grid=(B,),
        in_specs=in_specs,
        out_specs=pl.BlockSpec((None, N, f_out), lambda b: (b, 0, 0)),
    )

    return pl.pallas_call(
        _gcn_fused_kernel,
        out_shape=jax.ShapeDtypeStruct((B, N, f_out), jnp.float32),
        grid_spec=grid_spec,
        compiler_params=pltpu.CompilerParams(
            dimension_semantics=("parallel",),   # 2x on v7x megacore; no-op v5e/v6e
            vmem_limit_bytes=vmem_limit,
        ),
        cost_estimate=pl.CostEstimate(
            flops=flops,
            transcendentals=transcendentals,
            bytes_accessed=bytes_accessed,
        ),
    )(adj_bf16, x, r_src, r_dst, *weights_bf16)


# TODO(synk): for large single graphs (N beyond a few thousand) the adjacency
# must additionally be tiled over (dest_tile, src_tile) with a grid whose
# src/contraction axis is last and "arbitrary", 256-aligned MXU tiles, an f32
# VMEM accumulator, and only W + h kept fully resident (v7x VMEM is 64 MiB).


# ----------------------------------------------------------------------------
if __name__ == "__main__":
    B = 4                  # graphs per call (batch grid axis, "parallel")
    N = 128                # nodes per graph (lane-dense)
    IN_FEATURE = 128       # input feature size (lane-dense)
    LAYERS = [256, 128]    # exercises both matmul orderings (narrow->wide, wide->narrow)

    root = jax.random.PRNGKey(0)
    k_adj, k_x, k_w = jax.random.split(root, 3)

    adj = (jax.random.uniform(k_adj, (B, N, N)) < 0.3).astype(jnp.float32)
    x = jax.random.normal(k_x, (B, N, IN_FEATURE), jnp.float32)

    # Xavier-uniform-ish weights for each GraphConv layer (weight=True, bias=False).
    dims = [IN_FEATURE] + LAYERS
    weights = []
    for li in range(len(dims) - 1):
        k_w, k = jax.random.split(k_w)
        lim = (6.0 / (dims[li] + dims[li + 1])) ** 0.5
        weights.append(
            jax.random.uniform(k, (dims[li], dims[li + 1]), jnp.float32, -lim, lim)
        )

    out = gcn_forward(adj, x, weights)
    jax.block_until_ready(out)

    # Pure-JAX f32 reference of the same forward (DGL GraphConv norm='both').
    def ref_forward(adj, x, weights):
        in_deg = jnp.maximum(jnp.sum(adj, axis=2, keepdims=True), 1.0)   # (B,N,1)
        out_deg = jnp.maximum(jnp.sum(adj, axis=1, keepdims=True), 1.0)  # (B,1,N)
        adj_hat = adj * jax.lax.rsqrt(in_deg) * jax.lax.rsqrt(out_deg)
        h = x
        for w in weights:
            h = jnp.tanh(jnp.einsum("bij,bjf,fg->big", adj_hat, h, w))
        return h

    ref = ref_forward(adj, x, weights)

    assert out.shape == (B, N, LAYERS[-1])
    assert bool(jnp.all(jnp.isfinite(out)))
    assert bool(jnp.all(jnp.abs(out) <= 1.0))          # tanh output range
    max_err = float(jnp.max(jnp.abs(out - ref)))       # bf16 MXU vs f32 reference
    assert max_err < 5e-2, f"max abs error vs f32 reference too large: {max_err}"
    print("KERNEL_OK")
</pallas_src>

<mosaic_0001>
module attributes {stable_mosaic.version = 11 : i64} {
  func.func @_gcn_fused_kernel(%arg0: i32, %arg1: memref<1x128x128xbf16, #tpu.memory_space<vmem>>, %arg2: memref<1x128x128xf32, #tpu.memory_space<vmem>>, %arg3: memref<1x128x1xf32, #tpu.memory_space<vmem>>, %arg4: memref<1x128x1xf32, #tpu.memory_space<vmem>>, %arg5: memref<128x256xbf16, #tpu.memory_space<vmem>>, %arg6: memref<256x128xbf16, #tpu.memory_space<vmem>>, %arg7: memref<1x128x128xf32, #tpu.memory_space<vmem>>) attributes {dimension_semantics = [#tpu.dimension_semantics<parallel>], iteration_bounds = array<i64: 4>, scalar_prefetch = 0 : i64, scratch_operands = 0 : i64, tpu.core_type = #tpu.core_type<tc>, window_params = [{transform_indices = @transform_0, window_bounds = array<i64: 1, 128, 128>}, {transform_indices = @transform_1, window_bounds = array<i64: 1, 128, 128>}, {transform_indices = @transform_2, window_bounds = array<i64: 1, 128, 1>}, {transform_indices = @transform_3, window_bounds = array<i64: 1, 128, 1>}, {pipeline_mode = #tpu.pipeline_mode<synchronous>, transform_indices = @transform_4, window_bounds = array<i64: 128, 256>}, {pipeline_mode = #tpu.pipeline_mode<synchronous>, transform_indices = @transform_5, window_bounds = array<i64: 256, 128>}, {transform_indices = @transform_6, window_bounds = array<i64: 1, 128, 128>}]} {
    %c0 = arith.constant 0 : index
    %c0_0 = arith.constant 0 : index
    %c0_1 = arith.constant 0 : index
    %0 = vector.load %arg1[%c0, %c0_0, %c0_1] : memref<1x128x128xbf16, #tpu.memory_space<vmem>>, vector<1x128x128xbf16>
    %1 = vector.shape_cast %0 : vector<1x128x128xbf16> to vector<128x128xbf16>
    %c0_2 = arith.constant 0 : index
    %c0_3 = arith.constant 0 : index
    %c0_4 = arith.constant 0 : index
    %2 = vector.load %arg3[%c0_2, %c0_3, %c0_4] : memref<1x128x1xf32, #tpu.memory_space<vmem>>, vector<1x128x1xf32>
    %3 = vector.shape_cast %2 : vector<1x128x1xf32> to vector<128x1xf32>
    %c0_5 = arith.constant 0 : index
    %c0_6 = arith.constant 0 : index
    %c0_7 = arith.constant 0 : index
    %4 = vector.load %arg4[%c0_5, %c0_6, %c0_7] : memref<1x128x1xf32, #tpu.memory_space<vmem>>, vector<1x128x1xf32>
    %5 = vector.shape_cast %4 : vector<1x128x1xf32> to vector<128x1xf32>
    %c0_8 = arith.constant 0 : index
    %c0_9 = arith.constant 0 : index
    %c0_10 = arith.constant 0 : index
    %6 = vector.load %arg2[%c0_8, %c0_9, %c0_10] : memref<1x128x128xf32, #tpu.memory_space<vmem>>, vector<1x128x128xf32>
    %7 = vector.shape_cast %6 : vector<1x128x128xf32> to vector<128x128xf32>
    %c0_11 = arith.constant 0 : index
    %c0_12 = arith.constant 0 : index
    %8 = vector.load %arg5[%c0_11, %c0_12] : memref<128x256xbf16, #tpu.memory_space<vmem>>, vector<128x256xbf16>
    %9 = vector.broadcast %3 : vector<128x1xf32> to vector<128x128xf32>
    %10 = arith.mulf %7, %9 : vector<128x128xf32>
    %11 = arith.truncf %10 : vector<128x128xf32> to vector<128x128xbf16>
    %cst = arith.constant dense<0.000000e+00> : vector<128x128xf32>
    %12 = tpu.matmul %1, %11, %cst {dimension_numbers = #tpu.dot_dimension_numbers<[1], [0], [0], [1], [0, 0, 1, 1], [], []>} : vector<128x128xbf16>, vector<128x128xbf16>, vector<128x128xf32> -> vector<128x128xf32>
    %13 = vector.broadcast %5 : vector<128x1xf32> to vector<128x128xf32>
    %14 = arith.mulf %12, %13 : vector<128x128xf32>
    %15 = arith.truncf %14 : vector<128x128xf32> to vector<128x128xbf16>
    %cst_13 = arith.constant dense<0.000000e+00> : vector<128x256xf32>
    %16 = tpu.matmul %15, %8, %cst_13 {dimension_numbers = #tpu.dot_dimension_numbers<[1], [0], [0], [1], [0, 0, 1, 1], [], []>} : vector<128x128xbf16>, vector<128x256xbf16>, vector<128x256xf32> -> vector<128x256xf32>
    %17 = math.tanh %16 : vector<128x256xf32>
    %c0_14 = arith.constant 0 : index
    %c0_15 = arith.constant 0 : index
    %18 = vector.load %arg6[%c0_14, %c0_15] : memref<256x128xbf16, #tpu.memory_space<vmem>>, vector<256x128xbf16>
    %19 = arith.truncf %17 : vector<128x256xf32> to vector<128x256xbf16>
    %cst_16 = arith.constant dense<0.000000e+00> : vector<128x128xf32>
    %20 = tpu.matmul %19, %18, %cst_16 {dimension_numbers = #tpu.dot_dimension_numbers<[1], [0], [0], [1], [0, 0, 1, 1], [], []>} : vector<128x256xbf16>, vector<256x128xbf16>, vector<128x128xf32> -> vector<128x128xf32>
    %21 = vector.broadcast %3 : vector<128x1xf32> to vector<128x128xf32>
    %22 = arith.mulf %20, %21 : vector<128x128xf32>
    %23 = arith.truncf %22 : vector<128x128xf32> to vector<128x128xbf16>
    %cst_17 = arith.constant dense<0.000000e+00> : vector<128x128xf32>
    %24 = tpu.matmul %1, %23, %cst_17 {dimension_numbers = #tpu.dot_dimension_numbers<[1], [0], [0], [1], [0, 0, 1, 1], [], []>} : vector<128x128xbf16>, vector<128x128xbf16>, vector<128x128xf32> -> vector<128x128xf32>
    %25 = vector.broadcast %5 : vector<128x1xf32> to vector<128x128xf32>
    %26 = arith.mulf %24, %25 : vector<128x128xf32>
    %27 = math.tanh %26 : vector<128x128xf32>
    %c0_18 = arith.constant 0 : index
    %c0_19 = arith.constant 0 : index
    %c0_20 = arith.constant 0 : index
    %28 = vector.load %arg7[%c0_18, %c0_19, %c0_20] : memref<1x128x128xf32, #tpu.memory_space<vmem>>, vector<1x128x128xf32>
    %29 = vector.shape_cast %28 : vector<1x128x128xf32> to vector<128x128xf32>
    %30 = vector.shape_cast %27 : vector<128x128xf32> to vector<1x128x128xf32>
    tpu.vector_store %arg7[%c0_18, %c0_19, %c0_20], %30 {strides = array<i32>} : memref<1x128x128xf32, #tpu.memory_space<vmem>>, vector<1x128x128xf32>,
    return
  }
  func.func @transform_0(%arg0: i32) -> (i32, i32, i32) {
    %c0_i32 = arith.constant 0 : i32
    %c0_i32_0 = arith.constant 0 : i32
    %c0_i32_1 = arith.constant 0 : i32
    return %arg0, %c0_i32, %c0_i32_0 : i32, i32, i32
  }
  func.func @transform_1(%arg0: i32) -> (i32, i32, i32) {
    %c0_i32 = arith.constant 0 : i32
    %c0_i32_0 = arith.constant 0 : i32
    %c0_i32_1 = arith.constant 0 : i32
    return %arg0, %c0_i32, %c0_i32_0 : i32, i32, i32
  }
  func.func @transform_2(%arg0: i32) -> (i32, i32, i32) {
    %c0_i32 = arith.constant 0 : i32
    %c0_i32_0 = arith.constant 0 : i32
    %c0_i32_1 = arith.constant 0 : i32
    return %arg0, %c0_i32, %c0_i32_0 : i32, i32, i32
  }
  func.func @transform_3(%arg0: i32) -> (i32, i32, i32) {
    %c0_i32 = arith.constant 0 : i32
    %c0_i32_0 = arith.constant 0 : i32
    %c0_i32_1 = arith.constant 0 : i32
    return %arg0, %c0_i32, %c0_i32_0 : i32, i32, i32
  }
  func.func @transform_4(%arg0: i32) -> (i32, i32) {
    %c0_i32 = arith.constant 0 : i32
    %c0_i32_0 = arith.constant 0 : i32
    %c0_i32_1 = arith.constant 0 : i32
    return %c0_i32, %c0_i32_0 : i32, i32
  }
  func.func @transform_5(%arg0: i32) -> (i32, i32) {
    %c0_i32 = arith.constant 0 : i32
    %c0_i32_0 = arith.constant 0 : i32
    %c0_i32_1 = arith.constant 0 : i32
    return %c0_i32, %c0_i32_0 : i32, i32
  }
  func.func @transform_6(%arg0: i32) -> (i32, i32, i32) {
    %c0_i32 = arith.constant 0 : i32
    %c0_i32_0 = arith.constant 0 : i32
    %c0_i32_1 = arith.constant 0 : i32
    return %arg0, %c0_i32, %c0_i32_0 : i32, i32, i32
  }
}

</mosaic_0001>

<bundles_post_ra>
// kernel: tpu_custom_call.1
= control target key start
LH: loop header
LB: loop body
LE: loop exit
PB: predicated region body
PF: predicated region fallthrough
CT: control target
= control target key end

     0   :  { %11 = vsyncpa [#allocation3], 0  ;;  %s2461_s0 = inlined_call_operand.vmem [shape: bf16[4,128,128], index: 0, kind: input, shape index: {}]   ;;  %s2462_s1 = inlined_call_operand.vmem [shape: f32[4,128,128], index: 1, kind: input, shape index: {}]   ;;  %s2463_s2 = inlined_call_operand.vmem [shape: f32[4,128,1], index: 2, kind: input, shape index: {}]   ;;  %s2464_s3 = inlined_call_operand.vmem [shape: f32[4,128,1], index: 3, kind: input, shape index: {}]   ;;  %s2465_s4 = inlined_call_operand.vmem [shape: bf16[128,256], index: 4, kind: input, shape index: {}]   ;;  %s2466_s5 = inlined_call_operand.vmem [shape: bf16[256,128], index: 5, kind: input, shape index: {}]   ;;  %s2467_s6 = inlined_call_operand.hbm [shape: f32[4,128,128], index: 6, kind: output, shape index: {}]  }
   0x1   :  { %13 = vsyncpa [#allocation3 + $0x1], 0  ;;  %s2005_s21 = smov 0   ;;  %s2007_s22 = smov 0  }
   0x2   :  { %s2009_s23 = smov 0   ;;  %s2011_s24 = smov 0  }
   0x3 LB: > { %s2026_s25 = sadd.s32 4294967295, %s1964_s24   ;;  %s1491_s26 = sadd.s32 4294967294, %s1964_s24   ;;  %s1964_s24 = sphi %s2011_s24, %s2473_s24   ;;  %s1960_s23 = sphi %s2009_s23, %s2472_s23   ;;  %s1956_s22 = sphi %s2007_s22, %s2471_s22   ;;  %s1952_s21 = sphi %s2005_s21, %s2470_s21  }
   0x4   : > { %s2030_s27 = sadd.s32 1, %s1964_s24   ;;  %s172_s28 = sadd.s32 1, %s1960_s23 }
   0x5   : > { %s169_s29 = ssub.s32 %s1964_s24, %s2030_s27  ;;  %p182_p0 = scmp.ne.s32.totalorder %s1960_s23, %s1956_s22 }
   0x6   : > { %p170_p1 = scmp.eq.s32.totalorder %s169_s29, 0  ;;  %p183_p2 = scmp.eq.s32.totalorder %s2026_s25, 3 }
   0x7   : > { %p188_p3 = scmp.ne.s32.totalorder %s1956_s22, %s1952_s21  ;;  %p189_p4 = scmp.eq.s32.totalorder %s1491_s26, 3 }
   0x8   : > { %s2041_s30 = scalar_select %p170_p1, %s1960_s23, %s172_s28  }
   0x9   : > { %p2043_p5 = por %p183_p2, %p182_p0  ;;  %p2047_p6 = por %p189_p4, %p188_p3 }
   0xa   : > { %p1494_p7 = scmp.ge.s32.totalorder %s1964_s24, 1  ;;  %p245_p8 = scmp.lt.s32.totalorder %s1964_s24, 5 }
   0xc   : > { %p246_p9 = pnand %p1494_p7, %p245_p8 }
   0xd   : > { %p290_p10 = scmp.lt.s32.totalorder (!%p246_p9), %s2026_s25, 3  ;;  %v1966_v0 = vmov (!%p246_p9), 0   ;;  %v1766_v34 = vld [vmem:[%s2465_s4 + $0x4] ss:$8 sps:$4 sm:$0xff] (!%p246_p9)   ;;  %v1768_v35 = vld [vmem:[%s2465_s4] ss:$8 sps:$4 sm:$0xff] (!%p246_p9)  }
   0xe   : > { %249 = sbr.rel (%p246_p9) target bundleno = 1190 (0x4a6), region = 44  ;;  %1757 = vset.pattern.permute.xlu1 (!%p246_p9), %v1966_v0  ;;  %1756 = vset.pattern.permute.xlu0 (!%p246_p9), %v1966_v0  ;;  %v1769_v36 = vld [vmem:[%s2465_s4 + $0x14] ss:$8 sps:$4 sm:$0xff] (!%p246_p9)   ;;  %v1771_v37 = vld [vmem:[%s2465_s4 + $0x10] ss:$8 sps:$4 sm:$0xff] (!%p246_p9)   ;;  %s1553_s19 = sshll.u32 (!%p246_p9), %s2026_s25, 11 }
   0xf   : > { %856 = vmatprep.mubr.bf16.mxu1 (!%p246_p9), %v1966_v0  ;;  %824 = vmatprep.subr.bf16.mxu1 (!%p246_p9), %v1766_v34  ;;  %v1772_v38 = vld [vmem:[%s2465_s4 + $0x24] ss:$8 sps:$4 sm:$0xff] (!%p246_p9)   ;;  %v1774_v39 = vld [vmem:[%s2465_s4 + $0x20] ss:$8 sps:$4 sm:$0xff] (!%p246_p9)   ;;  %v1775_v40 = vld [vmem:[%s2465_s4 + $0x34] ss:$8 sps:$4 sm:$0xff] (!%p246_p9)   ;;  %s2411_s29 = scalar_lea.hbm (!%p246_p9), %s2467_s6, %s1553_s19 }
  0x10   : > { %825 = vmatpush1.bf16.msra.mxu1 (!%p246_p9), %v1768_v35  ;;  %v1777_v41 = vld [vmem:[%s2465_s4 + $0x30] ss:$8 sps:$4 sm:$0xff] (!%p246_p9)   ;;  %v1778_v42 = vld [vmem:[%s2465_s4 + $0x44] ss:$8 sps:$4 sm:$0xff] (!%p246_p9)   ;;  %v1780_v43 = vld [vmem:[%s2465_s4 + $0x40] ss:$8 sps:$4 sm:$0xff] (!%p246_p9)  }
  0x11   : > { %826 = vmatprep.subr.bf16.mxu1 (!%p246_p9), %v1769_v36  ;;  %v1781_v44 = vld [vmem:[%s2465_s4 + $0x54] ss:$8 sps:$4 sm:$0xff] (!%p246_p9)   ;;  %v1783_v45 = vld [vmem:[%s2465_s4 + $0x50] ss:$8 sps:$4 sm:$0xff] (!%p246_p9)   ;;  %s1967_s11 = smov (!%p246_p9), [#allocation2]  }
  0x12   : > { %s1906_s12 = sshll.u32 (!%p246_p9), %s1967_s11, 4  ;;  %s1907_s12 = int_to_ptr.vmem [resolvable:$false] %s1906_s12 }
  0x14   : > { %827 = vmatpush1.bf16.msra.mxu1 (!%p246_p9), %v1771_v37 }
  0x15   : > { %s2057_s9 = scalar_select %p290_p10, %s2026_s25, 3  ;;  %828 = vmatprep.subr.bf16.mxu1 %v1772_v38 }
  0x17   : > { %s2061_s10 = sshll.u32 %s2057_s9, 7  ;;  %s1549_s17 = sshll.u32 %s2057_s9, 6 }
  0x18   : > { %s304_s13 = scalar_lea.vmem %s2463_s2, %s2061_s10  ;;  %s2071_s16 = scalar_lea.vmem %s2464_s3, %s2061_s10  ;;  %829 = vmatpush1.bf16.msra.mxu1 %v1774_v39 }
  0x19   : > { %v329_v1 = vld [vmem:[%s304_s13 + $0x10] sm:$0xff]  ;;  %v327_v2 = vld [vmem:[%s304_s13] sm:$0xff]  ;;  %v330_v3 = vld [vmem:[%s304_s13 + $0x18] sm:$0xff]  ;;  %s2083_s20 = scalar_lea.vmem %s2461_s0, %s1549_s17  ;;  %830 = vmatprep.subr.bf16.mxu1 %v1775_v40  ;;  %s2139_s26 = scalar_lea.vmem %s2462_s1, %s2061_s10 }
  0x1a   : > { %403 = vperm.xlu1 %1757, %v329_v1   ;;  %393 = vperm.xlu0 %1756, %v327_v2   ;;  %v328_v4 = vld [vmem:[%s304_s13 + $0x8] sm:$0xff]  ;;  %v331_v6 = vld [vmem:[%s304_s13 + $0x20] sm:$0xff]  ;;  %v334_v7 = vld [vmem:[%s304_s13 + $0x38] sm:$0xff] }
  0x1b   : > { %v332_v5 = vld [vmem:[%s304_s13 + $0x28] sm:$0xff]  ;;  %v333_v8 = vld [vmem:[%s304_s13 + $0x30] sm:$0xff]  ;;  %v335_v10 = vld [vmem:[%s304_s13 + $0x40] sm:$0xff] }
  0x1c   : > { %v336_v9 = vld [vmem:[%s304_s13 + $0x48] sm:$0xff]  ;;  %v338_v11 = vld [vmem:[%s304_s13 + $0x58] sm:$0xff]  ;;  %v337_v12 = vld [vmem:[%s304_s13 + $0x50] sm:$0xff]  ;;  %831 = vmatpush1.bf16.msra.mxu1 %v1777_v41 }
  0x1d   : > { %v340_v13 = vld [vmem:[%s304_s13 + $0x68] sm:$0xff]  ;;  %v339_v14 = vld [vmem:[%s304_s13 + $0x60] sm:$0xff]  ;;  %v342_v15 = vld [vmem:[%s304_s13 + $0x78] sm:$0xff]  ;;  %832 = vmatprep.subr.bf16.mxu1 %v1778_v42 }
  0x1e   : > { %408 = vperm.xlu1 %1757, %v330_v3   ;;  %398 = vperm.xlu0 %1756, %v328_v4   ;;  %v341_v16 = vld [vmem:[%s304_s13 + $0x70] sm:$0xff]  ;;  %v344_v17 = vld [vmem:[%s2071_s16 + $0x8] sm:$0xff]  ;;  %v343_v18 = vld [vmem:[%s2071_s16] sm:$0xff]  ;;  %s1908_s13 = scalar_lea.vmem %s1907_s12, 4096 }
  0x1f   : > { %v346_v19 = vld [vmem:[%s2071_s16 + $0x18] sm:$0xff]  ;;  %v345_v20 = vld [vmem:[%s2071_s16 + $0x10] sm:$0xff]  ;;  %v348_v21 = vld [vmem:[%s2071_s16 + $0x28] sm:$0xff] }
  0x20   : > { %v347_v22 = vld [vmem:[%s2071_s16 + $0x20] sm:$0xff]  ;;  %v350_v24 = vld [vmem:[%s2071_s16 + $0x38] sm:$0xff]  ;;  %v349_v25 = vld [vmem:[%s2071_s16 + $0x30] sm:$0xff]  ;;  %833 = vmatpush1.bf16.msra.mxu1 %v1780_v43 }
  0x21   : > { %v2086_v23 = vld [vmem:[%s2083_s20] sm:$0xff]   ;;  %v352_v26 = vld [vmem:[%s2071_s16 + $0x48] sm:$0xff]  ;;  %v354_v28 = vld [vmem:[%s2071_s16 + $0x58] sm:$0xff]  ;;  %834 = vmatprep.subr.bf16.mxu1 %v1781_v44 }
  0x22   : > { %418 = vperm.xlu1 %1757, %v332_v5   ;;  %413 = vperm.xlu0 %1756, %v331_v6   ;;  %v351_v27 = vld [vmem:[%s2071_s16 + $0x40] sm:$0xff]  ;;  %v353_v29 = vld [vmem:[%s2071_s16 + $0x50] sm:$0xff]  ;;  %v356_v30 = vld [vmem:[%s2071_s16 + $0x68] sm:$0xff] }
  0x23   : > { %1666 = vmatprep.mubr.bf16.mxu0 %v2086_v23  ;;  %v355_v31 = vld [vmem:[%s2071_s16 + $0x60] sm:$0xff]  ;;  %v358_v32 = vld [vmem:[%s2071_s16 + $0x78] sm:$0xff]  ;;  %v357_v33 = vld [vmem:[%s2071_s16 + $0x70] sm:$0xff]  ;;  %s287_s16 = sand.u32 1, %s1956_s22  }
  0x24   : > { %835 = vmatpush1.bf16.msra.mxu1 %v1783_v45  ;;  %v361_v48 = vld [vmem:[%s2139_s26 + $0x10] sm:$0xff]  ;;  %v359_v49 = vld [vmem:[%s2139_s26] sm:$0xff]  ;;  %v362_v50 = vld [vmem:[%s2139_s26 + $0x18] sm:$0xff]  ;;  %s1495_s17 = sshll.u32 %s287_s16, 7  ;;  %s2420_s25 = scalar_lea.sflag [#allocation3], %s287_s16 }
  0x25   : > { %v360_v51 = vld [vmem:[%s2139_s26 + $0x8] sm:$0xff]  ;;  %v363_v59 = vld [vmem:[%s2139_s26 + $0x20] sm:$0xff]  ;;  %v366_v3 = vld [vmem:[%s2139_s26 + $0x38] sm:$0xff]  ;;  %s2383_s18 = scalar_lea.vmem [#allocation2], %s1495_s17 }
  0x26   : > { %428 = vperm.xlu1 %1757, %v334_v7   ;;  %423 = vperm.xlu0 %1756, %v333_v8   ;;  %v364_v58 = vld [vmem:[%s2139_s26 + $0x28] sm:$0xff]  ;;  %v365_v4 = vld [vmem:[%s2139_s26 + $0x30] sm:$0xff]  ;;  %v2214_v42 = vld [vmem:[%s2083_s20 + $0x18] sm:$0xff]  }
  0x27   : > { %v2206_v40 = vld [vmem:[%s2083_s20 + $0x8] sm:$0xff]   ;;  %v2209_v41 = vld [vmem:[%s2083_s20 + $0x10] sm:$0xff]   ;;  %v2217_v43 = vld [vmem:[%s2083_s20 + $0x20] sm:$0xff]  }
  0x28   : > { %v2222_v44 = vld [vmem:[%s2083_s20 + $0x28] sm:$0xff]   ;;  %v2225_v45 = vld [vmem:[%s2083_s20 + $0x30] sm:$0xff]  }
  0x2a   : > { %438 = vperm.xlu1 %1757, %v336_v9   ;;  %433 = vperm.xlu0 %1756, %v335_v10   ;;  %v368_v10 = vld [vmem:[%s2139_s26 + $0x48] sm:$0xff] }
  0x2e   : > { %448 = vperm.xlu1 %1757, %v338_v11   ;;  %443 = vperm.xlu0 %1756, %v337_v12   ;;  %v367_v11 = vld [vmem:[%s2139_s26 + $0x40] sm:$0xff] }
  0x32   : > { %458 = vperm.xlu1 %1757, %v340_v13   ;;  %453 = vperm.xlu0 %1756, %v339_v14  }
  0x36   : > { %468 = vperm.xlu1 %1757, %v342_v15   ;;  %463 = vperm.xlu0 %1756, %v341_v16  }
  0x3a   : > { %647 = vperm.xlu1 %1757, %v344_v17   ;;  %642 = vperm.xlu0 %1756, %v343_v18   ;;  %v370_v17 = vld [vmem:[%s2139_s26 + $0x58] sm:$0xff]  ;;  %v369_v18 = vld [vmem:[%s2139_s26 + $0x50] sm:$0xff] }
  0x3e   : > { %657 = vperm.xlu1 %1757, %v346_v19   ;;  %652 = vperm.xlu0 %1756, %v345_v20  }
  0x42   : > { %667 = vperm.xlu1 %1757, %v348_v21   ;;  %662 = vperm.xlu0 %1756, %v347_v22  }
  0x46   : > { %677 = vperm.xlu1 %1757, %v350_v24   ;;  %672 = vperm.xlu0 %1756, %v349_v25   ;;  %v372_v25 = vld [vmem:[%s2139_s26 + $0x68] sm:$0xff] }
  0x4a   : > { %687 = vperm.xlu1 %1757, %v352_v26   ;;  %682 = vperm.xlu0 %1756, %v351_v27   ;;  %v371_v26 = vld [vmem:[%s2139_s26 + $0x60] sm:$0xff] }
  0x4e   : > { %697 = vperm.xlu1 %1757, %v354_v28   ;;  %692 = vperm.xlu0 %1756, %v353_v29  }
  0x52   : > { %707 = vperm.xlu1 %1757, %v356_v30   ;;  %702 = vperm.xlu0 %1756, %v355_v31  }
  0x56   : > { %717 = vperm.xlu1 %1757, %v358_v32   ;;  %712 = vperm.xlu0 %1756, %v357_v33   ;;  %v374_v32 = vld [vmem:[%s2139_s26 + $0x78] sm:$0xff]  ;;  %v373_v33 = vld [vmem:[%s2139_s26 + $0x70] sm:$0xff]  ;;  %s1393_s26 = sshll.u32 %s2383_s18, 4  ;;  %s2413_s26 = int_to_ptr.vmem [resolvable:$true] %s1393_s26 }
  0x57   : > { %s1902_s9 = scalar_lea.vmem %s2413_s26, 2048  ;;  %p1909_p0 = scmp.lt.s32.totalorder %s2413_s26, %s1907_s12 }
  0x58   : > { %p1903_p11 = scmp.ne.s32.totalorder %s2413_s26, %s1902_s9  ;;  %p1910_p1 = scmp.lt.s32.totalorder %s1908_s13, %s1902_s9 }
  0x5a   : > { %p1904_p12 = pnand %p1903_p11, %p2043_p5  ;;  %p1911_p2 = por %p1910_p1, %p1909_p0 }
  0x5c   : > { %p1905_p13 = pneg %p1904_p12 }
  0x5e   : > { %p1912_p3 = pnand %p1911_p2, %p1905_p13 }
  0x99   : > { %v2141_v46 = vpop.permute.xlu1 %403  ;;  %v2143_v47 = vpop.permute.xlu0 %393 }
  0x9a   : > { %v473_v54 = vmul.f32 %v2141_v46, %v361_v48  ;;  %v471_v55 = vmul.f32 %v2143_v47, %v359_v49  ;;  %v2230_v48 = vld [vmem:[%s2083_s20 + $0x38] sm:$0xff]   ;;  %v1784_v49 = vld [vmem:[%s2465_s4 + $0x64] ss:$8 sps:$4 sm:$0xff]  }
  0x9b   : > { %836 = vmatprep.subr.bf16.mxu1 %v1784_v49 }
  0x9d   : > { %v2149_v52 = vpop.permute.xlu1 %408  ;;  %v2151_v53 = vpop.permute.xlu0 %398 }
  0x9e   : > { %v474_v56 = vmul.f32 %v2149_v52, %v362_v50  ;;  %v472_v57 = vmul.f32 %v2151_v53, %v360_v51  ;;  %v1786_v50 = vld [vmem:[%s2465_s4 + $0x60] ss:$8 sps:$4 sm:$0xff]   ;;  %v1787_v51 = vld [vmem:[%s2465_s4 + $0x74] ss:$8 sps:$4 sm:$0xff]  }
  0x9f   : > { %837 = vmatpush1.bf16.msra.mxu1 %v1786_v50 }
  0xa0   : > { %v487_v60 = vpack.c.bf16 %v472_v57, %v471_v55  ;;  %v488_v63 = vpack.c.bf16 %v474_v56, %v473_v54  ;;  %v1789_v54 = vld [vmem:[%s2465_s4 + $0x70] ss:$8 sps:$4 sm:$0xff]   ;;  %838 = vmatprep.subr.bf16.mxu1 %v1787_v51  ;;  %v1790_v55 = vld [vmem:[%s2466_s5 + $0x40] sm:$0xff]   ;;  %v1792_v57 = vld [vmem:[%s2466_s5 + $0x48] sm:$0xff]  }
  0xa1   : > { %v2159_v61 = vpop.permute.xlu1 %418  ;;  %v2161_v62 = vpop.permute.xlu0 %413  ;;  %v1791_v56 = vld [vmem:[%s2466_s5] sm:$0xff]  }
  0xa2   : > { %v476_v1 = vmul.f32 %v2159_v61, %v364_v58  ;;  %v475_v2 = vmul.f32 %v2161_v62, %v363_v59  ;;  %1650 = vmatprep.subr.bf16.mxu0 %v487_v60  ;;  %v1793_v58 = vld [vmem:[%s2466_s5 + $0x8] sm:$0xff]   ;;  %v1794_v59 = vld [vmem:[%s2466_s5 + $0x50] sm:$0xff]  }
  0xa3   : > { %1651 = vmatpush3.bf16.msra.mxu0 %v487_v60  ;;  %839 = vmatpush1.bf16.msra.mxu1 %v1789_v54  ;;  %v1795_v60 = vld [vmem:[%s2466_s5 + $0x10] sm:$0xff]  }
  0xa4   : > { %1652 = vmatprep.subr.bf16.mxu0 %v488_v63  ;;  %v489_v7 = vpack.c.bf16 %v476_v1, %v475_v2  ;;  %v1797_v1 = vld [vmem:[%s2466_s5 + $0x18] sm:$0xff]  }
  0xa5   : > { %v2167_v5 = vpop.permute.xlu1 %428  ;;  %v2169_v6 = vpop.permute.xlu0 %423 }
  0xa6   : > { %v478_v8 = vmul.f32 %v2167_v5, %v366_v3  ;;  %v477_v9 = vmul.f32 %v2169_v6, %v365_v4 }
  0xa7   : > { %1653 = vmatpush3.bf16.msra.mxu0 %v488_v63  ;;  %v1796_v63 = vld [vmem:[%s2466_s5 + $0x58] sm:$0xff]  }
  0xa8   : > { %1654 = vmatprep.subr.bf16.mxu0 %v489_v7  ;;  %v490_v14 = vpack.c.bf16 %v478_v8, %v477_v9 }
  0xa9   : > { %v2175_v12 = vpop.permute.xlu1 %438  ;;  %v2177_v13 = vpop.permute.xlu0 %433 }
  0xaa   : > { %v480_v15 = vmul.f32 %v2175_v12, %v368_v10  ;;  %v479_v16 = vmul.f32 %v2177_v13, %v367_v11 }
  0xab   : > { %1655 = vmatpush3.bf16.msra.mxu0 %v489_v7 }
  0xac   : > { %1656 = vmatprep.subr.bf16.mxu0 %v490_v14  ;;  %v491_v21 = vpack.c.bf16 %v480_v15, %v479_v16 }
  0xad   : > { %v2183_v19 = vpop.permute.xlu1 %448  ;;  %v2185_v20 = vpop.permute.xlu0 %443 }
  0xae   : > { %v482_v22 = vmul.f32 %v2183_v19, %v370_v17  ;;  %v481_v24 = vmul.f32 %v2185_v20, %v369_v18 }
  0xaf   : > { %1657 = vmatpush3.bf16.msra.mxu0 %v490_v14 }
  0xb0   : > { %1658 = vmatprep.subr.bf16.mxu0 %v491_v21  ;;  %v492_v29 = vpack.c.bf16 %v482_v22, %v481_v24 }
  0xb1   : > { %v2191_v27 = vpop.permute.xlu1 %458  ;;  %v2193_v28 = vpop.permute.xlu0 %453 }
  0xb2   : > { %v484_v30 = vmul.f32 %v2191_v27, %v372_v25  ;;  %v483_v31 = vmul.f32 %v2193_v28, %v371_v26 }
  0xb3   : > { %1659 = vmatpush3.bf16.msra.mxu0 %v491_v21 }
  0xb4   : > { %1660 = vmatprep.subr.bf16.mxu0 %v492_v29  ;;  %v493_v36 = vpack.c.bf16 %v484_v30, %v483_v31 }
  0xb5   : > { %v2199_v34 = vpop.permute.xlu1 %468  ;;  %v2201_v35 = vpop.permute.xlu0 %463 }
  0xb6   : > { %v486_v37 = vmul.f32 %v2199_v34, %v374_v32  ;;  %v485_v38 = vmul.f32 %v2201_v35, %v373_v33 }
  0xb7   : > { %1661 = vmatpush3.bf16.msra.mxu0 %v492_v29 }
  0xb8   : > { %1662 = vmatprep.subr.bf16.mxu0 %v493_v36  ;;  %v494_v39 = vpack.c.bf16 %v486_v37, %v485_v38 }
  0xb9   : > { %v2269_v2 = vpop.permute.xlu1 %647  ;;  %v2271_v3 = vpop.permute.xlu0 %642 }
  0xbb   : > { %1663 = vmatpush3.bf16.msra.mxu0 %v493_v36 }
  0xbc   : > { %1664 = vmatprep.subr.bf16.mxu0 %v494_v39 }
  0xbd   : > { %v2273_v4 = vpop.permute.xlu1 %657  ;;  %v2275_v7 = vpop.permute.xlu0 %652 }
  0xbf   : > { %1665 = vmatpush3.bf16.msra.mxu0 %v494_v39 }
  0xc0   : > { %1570 = vmatprep.subr.bf16.mxu0 %v1790_v55 }
  0xc1   : > { %v2277_v8 = vpop.permute.xlu1 %667  ;;  %v2279_v9 = vpop.permute.xlu0 %662 }
  0xc2   : > { %1667 = vmatmul.mubr.bf16.vlgmr.msra.gmra.mrb[0].mxu0 %v2206_v40 }
  0xc3   : > { %1670 = vmatprep.mubr.bf16.mxu0 %v2209_v41  ;;  %1571 = vmatpush3.bf16.msra.mxu0 %v1791_v56 }
  0xc4   : > { %1572 = vmatprep.subr.bf16.mxu0 %v1792_v57 }
  0xc5   : > { %v2281_v11 = vpop.permute.xlu1 %677  ;;  %v2283_v15 = vpop.permute.xlu0 %672 }
  0xc7   : > { %1573 = vmatpush3.bf16.msra.mxu0 %v1793_v58 }
  0xc8   : > { %1574 = vmatprep.subr.bf16.mxu0 %v1794_v59 }
  0xc9   : > { %v2289_v29 = vpop.permute.xlu1 %687  ;;  %v2291_v30 = vpop.permute.xlu0 %682 }
  0xca   : > { %1671 = vmatmul.mubr.bf16.gmra.mrb[4].mxu0 %v2214_v42 }
  0xcb   : > { %1674 = vmatprep.mubr.bf16.mxu0 %v2217_v43  ;;  %1575 = vmatpush3.bf16.msra.mxu0 %v1795_v60 }
  0xcc   : > { %1576 = vmatprep.subr.bf16.mxu0 %v1796_v63 }
  0xcd   : > { %v2298_v50 = vpop.permute.xlu1 %697  ;;  %v2300_v54 = vpop.permute.xlu0 %692 }
  0xcf   : > { %1577 = vmatpush3.bf16.msra.mxu0 %v1797_v1 }
  0xd1   : > { %v2303_v59 = vpop.permute.xlu1 %707 }
  0xd2   : > { %1675 = vmatmul.mubr.bf16.gmra.mrb[8].mxu0 %v2222_v44 }
  0xd3   : > { %1678 = vmatprep.mubr.bf16.mxu0 %v2225_v45 }
  0xda   : > { %1679 = vmatmul.mubr.bf16.gmra.mrb[12].mxu0 %v2230_v48 }
 0x195   : > { %v1668_v10 = vpop.f32.mrb[0].mxu0 }
 0x196   : > { %v577_v14 = vpop.f32.mrb[1].mxu0  ;;  %v722_v17 = vmul.f32 %v1668_v10, %v2275_v7  ;;  %v2307_v10 = vpop.permute.xlu0 %702 }
 0x197   : > { %v1669_v16 = vpop.f32.mrb[2].mxu0  ;;  %v720_v22 = vmul.f32 %v2271_v3, %v577_v14 }
 0x198   : > { %v723_v18 = vmul.f32 %v1669_v16, %v2273_v4  ;;  %v580_v21 = vpop.f32.mrb[3].mxu0 }
 0x199   : > { %v721_v24 = vmul.f32 %v2269_v2, %v580_v21 }
 0x19a   : > { %v737_v25 = vpack.c.bf16 %v723_v18, %v722_v17 }
 0x19b   : > { %v736_v26 = vpack.c.bf16 %v721_v24, %v720_v22  ;;  %v2311_v22 = vpop.permute.xlu1 %717 }
 0x19d   : > { %v1672_v31 = vpop.f32.mrb[4].mxu0  ;;  %857 = vmatmul.mubr.bf16.vlgmr.msra.gmra.mrb[0].mxu1 %v736_v26 }
 0x19e   : > { %v593_v32 = vpop.f32.mrb[5].mxu0  ;;  %866 = vmatprep.mubr.bf16.mxu1 %v1966_v0  ;;  %v726_v36 = vmul.f32 %v1672_v31, %v2283_v15 }
 0x19f   : > { %v1673_v33 = vpop.f32.mrb[6].mxu0  ;;  %v724_v39 = vmul.f32 %v2279_v9, %v593_v32 }
 0x1a0   : > { %v727_v37 = vmul.f32 %v1673_v33, %v2281_v11  ;;  %v596_v38 = vpop.f32.mrb[7].mxu0 }
 0x1a1   : > { %v725_v49 = vmul.f32 %v2277_v8, %v596_v38 }
 0x1a2   : > { %v739_v51 = vpack.c.bf16 %v727_v37, %v726_v36 }
 0x1a3   : > { %v738_v55 = vpack.c.bf16 %v725_v49, %v724_v39  ;;  %v1798_v49 = vld [vmem:[%s2466_s5 + $0x60] sm:$0xff]  }
 0x1a4   : > { %1578 = vmatprep.subr.bf16.mxu0 %v1798_v49 }
 0x1a5   : > { %v1676_v56 = vpop.f32.mrb[8].mxu0  ;;  %867 = vmatmul.mubr.bf16.gmra.mrb[4].mxu1 %v737_v25  ;;  %v2314_v25 = vpop.permute.xlu0 %712 }
 0x1a6   : > { %v609_v57 = vpop.f32.mrb[9].mxu0  ;;  %876 = vmatprep.mubr.bf16.mxu1 %v1966_v0  ;;  %v730_v60 = vmul.f32 %v1676_v56, %v2300_v54  ;;  %v1803_v56 = vld [vmem:[%s2466_s5 + $0x30] sm:$0xff]  }
 0x1a7   : > { %v1677_v58 = vpop.f32.mrb[10].mxu0  ;;  %v728_v14 = vmul.f32 %v2291_v30, %v609_v57  ;;  %v1804_v57 = vld [vmem:[%s2466_s5 + $0x78] sm:$0xff]  }
 0x1a8   : > { %v731_v63 = vmul.f32 %v1677_v58, %v2298_v50  ;;  %v612_v1 = vpop.f32.mrb[11].mxu0  ;;  %v1805_v58 = vld [vmem:[%s2466_s5 + $0x38] sm:$0xff]  }
 0x1a9   : > { %v729_v16 = vmul.f32 %v2289_v29, %v612_v1 }
 0x1aa   : > { %v741_v17 = vpack.c.bf16 %v731_v63, %v730_v60 }
 0x1ab   : > { %v740_v18 = vpack.c.bf16 %v729_v16, %v728_v14 }
 0x1ad   : > { %v1680_v21 = vpop.f32.mrb[12].mxu0  ;;  %877 = vmatmul.mubr.bf16.gmra.mrb[8].mxu1 %v738_v55  ;;  %v1800_v55 = vld [vmem:[%s2466_s5 + $0x68] sm:$0xff]  }
 0x1ae   : > { %v625_v24 = vpop.f32.mrb[13].mxu0  ;;  %886 = vmatprep.mubr.bf16.mxu1 %v1966_v0  ;;  %v734_v31 = vmul.f32 %v1680_v21, %v2314_v25 }
 0x1af   : > { %v1681_v26 = vpop.f32.mrb[14].mxu0  ;;  %v732_v36 = vmul.f32 %v2307_v10, %v625_v24 }
 0x1b0   : > { %v735_v32 = vmul.f32 %v1681_v26, %v2311_v22  ;;  %v628_v33 = vpop.f32.mrb[15].mxu0 }
 0x1b1   : > { %v733_v37 = vmul.f32 %v2303_v59, %v628_v33 }
 0x1b2   : > { %v743_v38 = vpack.c.bf16 %v735_v32, %v734_v31 }
 0x1b3   : > { %v742_v39 = vpack.c.bf16 %v733_v37, %v732_v36 }
 0x1b5   : > { %887 = vmatmul.mubr.bf16.gmra.mrb[12].mxu1 %v739_v51  ;;  %v1799_v51 = vld [vmem:[%s2466_s5 + $0x20] sm:$0xff]  }
 0x1b6   : > { %896 = vmatprep.mubr.bf16.mxu1 %v1966_v0  ;;  %1579 = vmatpush3.bf16.msra.mxu0 %v1799_v51 }
 0x1b7   : > { %1580 = vmatprep.subr.bf16.mxu0 %v1800_v55 }
 0x1bd   : > { %897 = vmatmul.mubr.bf16.gmra.mrb[16].mxu1 %v740_v18 }
 0x1be   : > { %906 = vmatprep.mubr.bf16.mxu1 %v1966_v0 }
 0x1c5   : > { %907 = vmatmul.mubr.bf16.gmra.mrb[20].mxu1 %v741_v17 }
 0x1c6   : > { %916 = vmatprep.mubr.bf16.mxu1 %v1966_v0 }
 0x1cd   : > { %917 = vmatmul.mubr.bf16.gmra.mrb[24].mxu1 %v742_v39 }
 0x1ce   : > { %926 = vmatprep.mubr.bf16.mxu1 %v1966_v0  ;;  %v1801_v0 = vld [vmem:[%s2466_s5 + $0x28] sm:$0xff]  }
 0x1cf   : > { %1581 = vmatpush3.bf16.msra.mxu0 %v1801_v0 }
 0x1d5   : > { %927 = vmatmul.mubr.bf16.gmra.mrb[28].mxu1 %v743_v38 }
 0x1d6   : > { %1698 = vmatprep.mubr.bf16.mxu1 %v2086_v23  ;;  %v1802_v23 = vld [vmem:[%s2466_s5 + $0x70] sm:$0xff]  }
 0x1d7   : > { %1582 = vmatprep.subr.bf16.mxu0 %v1802_v23 }
 0x1d8   : > { %1583 = vmatpush3.bf16.msra.mxu0 %v1803_v56 }
 0x1d9   : > { %1584 = vmatprep.subr.bf16.mxu0 %v1804_v57 }
 0x1dc   : > { %1585 = vmatpush3.bf16.msra.mxu0 %v1805_v58 }
 0x270   : > { %v858_v60 = vpop.f32.mrb[0].mxu1 }
 0x271   : > { %1806 = vtanh.f32 %v858_v60  ;;  %v860_v63 = vpop.f32.mrb[1].mxu1 }
 0x272   : > { %1808 = vtanh.f32 %v860_v63  ;;  %v862_v1 = vpop.f32.mrb[2].mxu1 }
 0x273   : > { %1810 = vtanh.f32 %v862_v1  ;;  %v864_v14 = vpop.f32.mrb[3].mxu1 }
 0x274   : > { %1812 = vtanh.f32 %v864_v14 }
 0x278   : > { %v868_v16 = vpop.f32.mrb[4].mxu1 }
 0x279   : > { %1814 = vtanh.f32 %v868_v16  ;;  %v870_v17 = vpop.f32.mrb[5].mxu1 }
 0x27a   : > { %1816 = vtanh.f32 %v870_v17  ;;  %v872_v18 = vpop.f32.mrb[6].mxu1 }
 0x27b   : > { %v1807_v21 = vpop.eup %1806  ;;  %1818 = vtanh.f32 %v872_v18  ;;  %v874_v24 = vpop.f32.mrb[7].mxu1 }
 0x27c   : > { %v1809_v26 = vpop.eup %1808  ;;  %1820 = vtanh.f32 %v874_v24 }
 0x27d   : > { %v1811_v31 = vpop.eup %1810 }
 0x27e   : > { %v1813_v32 = vpop.eup %1812  ;;  %v1001_v33 = vpack.c.bf16 %v1811_v31, %v1807_v21 }
 0x27f   : > { %v1002_v36 = vpack.c.bf16 %v1813_v32, %v1809_v26 }
 0x280   : > { %v878_v37 = vpop.f32.mrb[8].mxu1 }
 0x281   : > { %1822 = vtanh.f32 %v878_v37  ;;  %v880_v38 = vpop.f32.mrb[9].mxu1  ;;  %1145 = vmatprep.mubr.bf16.mxu0 %v1002_v36 }
 0x282   : > { %1824 = vtanh.f32 %v880_v38  ;;  %v882_v39 = vpop.f32.mrb[10].mxu1  ;;  %1146 = vmatmul.mubr.bf16.vlgmr.msra.gmra.mrb[16].mxu0 %v1001_v33 }
 0x283   : > { %v1815_v49 = vpop.eup %1814  ;;  %1826 = vtanh.f32 %v882_v39  ;;  %v884_v51 = vpop.f32.mrb[11].mxu1 }
 0x284   : > { %v1817_v55 = vpop.eup %1816  ;;  %1828 = vtanh.f32 %v884_v51 }
 0x285   : > { %v1819_v0 = vpop.eup %1818 }
 0x286   : > { %v1821_v23 = vpop.eup %1820  ;;  %v1003_v56 = vpack.c.bf16 %v1819_v0, %v1815_v49 }
 0x287   : > { %v1004_v57 = vpack.c.bf16 %v1821_v23, %v1817_v55 }
 0x288   : > { %v888_v58 = vpop.f32.mrb[12].mxu1 }
 0x289   : > { %1830 = vtanh.f32 %v888_v58  ;;  %v890_v60 = vpop.f32.mrb[13].mxu1  ;;  %1153 = vmatprep.mubr.bf16.mxu0 %v1004_v57 }
 0x28a   : > { %1832 = vtanh.f32 %v890_v60  ;;  %v892_v63 = vpop.f32.mrb[14].mxu1  ;;  %1154 = vmatmul.mubr.bf16.gmra.mrb[20].mxu0 %v1003_v56 }
 0x28b   : > { %v1823_v1 = vpop.eup %1822  ;;  %1834 = vtanh.f32 %v892_v63  ;;  %v894_v14 = vpop.f32.mrb[15].mxu1 }
 0x28c   : > { %v1825_v16 = vpop.eup %1824  ;;  %1836 = vtanh.f32 %v894_v14 }
 0x28d   : > { %v1827_v17 = vpop.eup %1826 }
 0x28e   : > { %v1829_v18 = vpop.eup %1828  ;;  %v1005_v21 = vpack.c.bf16 %v1827_v17, %v1823_v1 }
 0x28f   : > { %v1006_v24 = vpack.c.bf16 %v1829_v18, %v1825_v16 }
 0x290   : > { %v898_v26 = vpop.f32.mrb[16].mxu1 }
 0x291   : > { %1838 = vtanh.f32 %v898_v26  ;;  %v900_v31 = vpop.f32.mrb[17].mxu1  ;;  %1161 = vmatprep.mubr.bf16.mxu0 %v1006_v24 }
 0x292   : > { %1840 = vtanh.f32 %v900_v31  ;;  %v902_v32 = vpop.f32.mrb[18].mxu1  ;;  %1162 = vmatmul.mubr.bf16.gmra.mrb[24].mxu0 %v1005_v21 }
 0x293   : > { %v1831_v33 = vpop.eup %1830  ;;  %1842 = vtanh.f32 %v902_v32  ;;  %v904_v36 = vpop.f32.mrb[19].mxu1 }
 0x294   : > { %v1833_v37 = vpop.eup %1832  ;;  %1844 = vtanh.f32 %v904_v36 }
 0x295   : > { %v1835_v38 = vpop.eup %1834 }
 0x296   : > { %v1837_v39 = vpop.eup %1836  ;;  %v1007_v49 = vpack.c.bf16 %v1835_v38, %v1831_v33 }
 0x297   : > { %v1008_v51 = vpack.c.bf16 %v1837_v39, %v1833_v37 }
 0x298   : > { %v908_v55 = vpop.f32.mrb[20].mxu1 }
 0x299   : > { %1846 = vtanh.f32 %v908_v55  ;;  %v910_v0 = vpop.f32.mrb[21].mxu1  ;;  %1169 = vmatprep.mubr.bf16.mxu0 %v1008_v51 }
 0x29a   : > { %1848 = vtanh.f32 %v910_v0  ;;  %v912_v23 = vpop.f32.mrb[22].mxu1  ;;  %1170 = vmatmul.mubr.bf16.gmra.mrb[28].mxu0 %v1007_v49 }
 0x29b   : > { %v1839_v56 = vpop.eup %1838  ;;  %1850 = vtanh.f32 %v912_v23  ;;  %v914_v57 = vpop.f32.mrb[23].mxu1 }
 0x29c   : > { %v1841_v58 = vpop.eup %1840  ;;  %1852 = vtanh.f32 %v914_v57 }
 0x29d   : > { %v1843_v60 = vpop.eup %1842 }
 0x29e   : > { %v1845_v63 = vpop.eup %1844  ;;  %v1009_v1 = vpack.c.bf16 %v1843_v60, %v1839_v56 }
 0x29f   : > { %v1010_v14 = vpack.c.bf16 %v1845_v63, %v1841_v58 }
 0x2a0   : > { %v918_v16 = vpop.f32.mrb[24].mxu1 }
 0x2a1   : > { %1854 = vtanh.f32 %v918_v16  ;;  %v920_v17 = vpop.f32.mrb[25].mxu1  ;;  %1177 = vmatprep.mubr.bf16.mxu0 %v1010_v14 }
 0x2a2   : > { %1856 = vtanh.f32 %v920_v17  ;;  %v922_v18 = vpop.f32.mrb[26].mxu1  ;;  %1178 = vmatmul.mubr.bf16.gmra.mrb[32].mxu0 %v1009_v1 }
 0x2a3   : > { %v1847_v21 = vpop.eup %1846  ;;  %1858 = vtanh.f32 %v922_v18  ;;  %v924_v24 = vpop.f32.mrb[27].mxu1 }
 0x2a4   : > { %v1849_v26 = vpop.eup %1848  ;;  %1860 = vtanh.f32 %v924_v24 }
 0x2a5   : > { %v1851_v31 = vpop.eup %1850 }
 0x2a6   : > { %v1853_v32 = vpop.eup %1852  ;;  %v1011_v33 = vpack.c.bf16 %v1851_v31, %v1847_v21 }
 0x2a7   : > { %v1012_v36 = vpack.c.bf16 %v1853_v32, %v1849_v26 }
 0x2a8   : > { %v928_v37 = vpop.f32.mrb[28].mxu1 }
 0x2a9   : > { %1862 = vtanh.f32 %v928_v37  ;;  %v930_v38 = vpop.f32.mrb[29].mxu1  ;;  %1185 = vmatprep.mubr.bf16.mxu0 %v1012_v36 }
 0x2aa   : > { %1864 = vtanh.f32 %v930_v38  ;;  %v932_v39 = vpop.f32.mrb[30].mxu1  ;;  %1186 = vmatmul.mubr.bf16.gmra.mrb[36].mxu0 %v1011_v33 }
 0x2ab   : > { %v1855_v49 = vpop.eup %1854  ;;  %1866 = vtanh.f32 %v932_v39  ;;  %v934_v51 = vpop.f32.mrb[31].mxu1 }
 0x2ac   : > { %v1857_v55 = vpop.eup %1856  ;;  %1868 = vtanh.f32 %v934_v51 }
 0x2ad   : > { %v1859_v0 = vpop.eup %1858 }
 0x2ae   : > { %v1861_v23 = vpop.eup %1860  ;;  %v1013_v56 = vpack.c.bf16 %v1859_v0, %v1855_v49 }
 0x2af   : > { %v1014_v57 = vpack.c.bf16 %v1861_v23, %v1857_v55 }
 0x2b1   : > { %1193 = vmatprep.mubr.bf16.mxu0 %v1014_v57 }
 0x2b2   : > { %1194 = vmatmul.mubr.bf16.gmra.mrb[40].mxu0 %v1013_v56 }
 0x2b3   : > { %v1863_v58 = vpop.eup %1862 }
 0x2b4   : > { %v1865_v60 = vpop.eup %1864 }
 0x2b5   : > { %v1867_v63 = vpop.eup %1866 }
 0x2b6   : > { %v1869_v1 = vpop.eup %1868  ;;  %v1015_v14 = vpack.c.bf16 %v1867_v63, %v1863_v58 }
 0x2b7   : > { %v1016_v16 = vpack.c.bf16 %v1869_v1, %v1865_v60 }
 0x2b9   : > { %1201 = vmatprep.mubr.bf16.mxu0 %v1016_v16 }
 0x2ba   : > { %1202 = vmatmul.mubr.bf16.gmra.mrb[44].mxu0 %v1015_v14 }
 0x355   : > { %v1586_v17 = vpop.f32.mrb[16].mxu0 }
 0x356   : > { %v1587_v18 = vpop.f32.mrb[17].mxu0 }
 0x357   : > { %v1588_v21 = vadd.f32 %v1587_v18, %v1586_v17  ;;  %v1589_v24 = vpop.f32.mrb[18].mxu0 }
 0x358   : > { %v1590_v26 = vpop.f32.mrb[19].mxu0 }
 0x359   : > { %v1591_v31 = vadd.f32 %v1590_v26, %v1589_v24  ;;  %v1210_v32 = vmul.f32 %v1588_v21, %v2143_v47 }
 0x35b   : > { %v1211_v33 = vmul.f32 %v1591_v31, %v2151_v53 }
 0x35d   : > { %v1592_v36 = vpop.f32.mrb[20].mxu0  ;;  %v1226_v37 = vpack.c.bf16 %v1211_v33, %v1210_v32 }
 0x35e   : > { %v1593_v38 = vpop.f32.mrb[21].mxu0 }
 0x35f   : > { %v1594_v39 = vadd.f32 %v1593_v38, %v1592_v36  ;;  %v1595_v49 = vpop.f32.mrb[22].mxu0  ;;  %1682 = vmatprep.subr.bf16.mxu1 %v1226_v37 }
 0x360   : > { %v1596_v51 = vpop.f32.mrb[23].mxu0  ;;  %1683 = vmatpush3.bf16.msra.mxu1 %v1226_v37 }
 0x361   : > { %v1597_v55 = vadd.f32 %v1596_v51, %v1595_v49  ;;  %v1212_v0 = vmul.f32 %v1594_v39, %v2141_v46 }
 0x363   : > { %v1213_v23 = vmul.f32 %v1597_v55, %v2149_v52 }
 0x365   : > { %v1598_v56 = vpop.f32.mrb[24].mxu0  ;;  %v1227_v57 = vpack.c.bf16 %v1213_v23, %v1212_v0 }
 0x366   : > { %v1599_v58 = vpop.f32.mrb[25].mxu0 }
 0x367   : > { %v1600_v60 = vadd.f32 %v1599_v58, %v1598_v56  ;;  %v1601_v47 = vpop.f32.mrb[26].mxu0  ;;  %1684 = vmatprep.subr.bf16.mxu1 %v1227_v57 }
 0x368   : > { %v1602_v53 = vpop.f32.mrb[27].mxu0  ;;  %1685 = vmatpush3.bf16.msra.mxu1 %v1227_v57 }
 0x369   : > { %v1603_v63 = vadd.f32 %v1602_v53, %v1601_v47  ;;  %v1214_v1 = vmul.f32 %v1600_v60, %v2161_v62 }
 0x36b   : > { %v1215_v14 = vmul.f32 %v1603_v63, %v2159_v61 }
 0x36d   : > { %v1604_v16 = vpop.f32.mrb[28].mxu0  ;;  %v1228_v17 = vpack.c.bf16 %v1215_v14, %v1214_v1 }
 0x36e   : > { %v1605_v18 = vpop.f32.mrb[29].mxu0 }
 0x36f   : > { %v1606_v21 = vadd.f32 %v1605_v18, %v1604_v16  ;;  %v1607_v46 = vpop.f32.mrb[30].mxu0  ;;  %1686 = vmatprep.subr.bf16.mxu1 %v1228_v17 }
 0x370   : > { %v1608_v52 = vpop.f32.mrb[31].mxu0  ;;  %1687 = vmatpush3.bf16.msra.mxu1 %v1228_v17 }
 0x371   : > { %v1609_v24 = vadd.f32 %v1608_v52, %v1607_v46  ;;  %v1216_v26 = vmul.f32 %v1606_v21, %v2169_v6 }
 0x373   : > { %v1217_v31 = vmul.f32 %v1609_v24, %v2167_v5 }
 0x375   : > { %v1610_v32 = vpop.f32.mrb[32].mxu0  ;;  %v1229_v33 = vpack.c.bf16 %v1217_v31, %v1216_v26 }
 0x376   : > { %v1611_v36 = vpop.f32.mrb[33].mxu0 }
 0x377   : > { %v1612_v37 = vadd.f32 %v1611_v36, %v1610_v32  ;;  %v1613_v62 = vpop.f32.mrb[34].mxu0  ;;  %1688 = vmatprep.subr.bf16.mxu1 %v1229_v33 }
 0x378   : > { %v1614_v61 = vpop.f32.mrb[35].mxu0  ;;  %1689 = vmatpush3.bf16.msra.mxu1 %v1229_v33 }
 0x379   : > { %v1615_v38 = vadd.f32 %v1614_v61, %v1613_v62  ;;  %v1218_v39 = vmul.f32 %v1612_v37, %v2177_v13 }
 0x37b   : > { %v1219_v49 = vmul.f32 %v1615_v38, %v2175_v12 }
 0x37d   : > { %v1616_v51 = vpop.f32.mrb[36].mxu0  ;;  %v1230_v55 = vpack.c.bf16 %v1219_v49, %v1218_v39 }
 0x37e   : > { %v1617_v0 = vpop.f32.mrb[37].mxu0 }
 0x37f   : > { %v1618_v23 = vadd.f32 %v1617_v0, %v1616_v51  ;;  %v1619_v6 = vpop.f32.mrb[38].mxu0  ;;  %1690 = vmatprep.subr.bf16.mxu1 %v1230_v55 }
 0x380   : > { %v1620_v5 = vpop.f32.mrb[39].mxu0  ;;  %1691 = vmatpush3.bf16.msra.mxu1 %v1230_v55 }
 0x381   : > { %v1621_v56 = vadd.f32 %v1620_v5, %v1619_v6  ;;  %v1220_v57 = vmul.f32 %v1618_v23, %v2185_v20 }
 0x383   : > { %v1221_v58 = vmul.f32 %v1621_v56, %v2183_v19 }
 0x385   : > { %v1622_v60 = vpop.f32.mrb[40].mxu0  ;;  %v1231_v47 = vpack.c.bf16 %v1221_v58, %v1220_v57 }
 0x386   : > { %v1623_v53 = vpop.f32.mrb[41].mxu0 }
 0x387   : > { %v1624_v63 = vadd.f32 %v1623_v53, %v1622_v60  ;;  %v1625_v13 = vpop.f32.mrb[42].mxu0  ;;  %1692 = vmatprep.subr.bf16.mxu1 %v1231_v47 }
 0x388   : > { %v1626_v12 = vpop.f32.mrb[43].mxu0  ;;  %1693 = vmatpush3.bf16.msra.mxu1 %v1231_v47 }
 0x389   : > { %v1627_v1 = vadd.f32 %v1626_v12, %v1625_v13  ;;  %v1222_v14 = vmul.f32 %v1624_v63, %v2193_v28 }
 0x38b   : > { %v1223_v16 = vmul.f32 %v1627_v1, %v2191_v27 }
 0x38d   : > { %v1628_v17 = vpop.f32.mrb[44].mxu0  ;;  %v1232_v18 = vpack.c.bf16 %v1223_v16, %v1222_v14 }
 0x38e   : > { %v1629_v21 = vpop.f32.mrb[45].mxu0 }
 0x38f   : > { %v1630_v46 = vadd.f32 %v1629_v21, %v1628_v17  ;;  %v1631_v20 = vpop.f32.mrb[46].mxu0  ;;  %1694 = vmatprep.subr.bf16.mxu1 %v1232_v18 }
 0x390   : > { %v1632_v19 = vpop.f32.mrb[47].mxu0  ;;  %1695 = vmatpush3.bf16.msra.mxu1 %v1232_v18 }
 0x391   : > { %v1633_v52 = vadd.f32 %v1632_v19, %v1631_v20  ;;  %v1224_v24 = vmul.f32 %v1630_v46, %v2201_v35 }
 0x393   : > { %v1225_v26 = vmul.f32 %v1633_v52, %v2199_v34 }
 0x395   : > { %v1233_v31 = vpack.c.bf16 %v1225_v26, %v1224_v24 }
 0x397   : > { %1696 = vmatprep.subr.bf16.mxu1 %v1233_v31 }
 0x398   : > { %1697 = vmatpush3.bf16.msra.mxu1 %v1233_v31 }
 0x39b   : > { %1699 = vmatmul.mubr.bf16.vlgmr.msra.gmra.mrb[32].mxu1 %v2206_v40 }
 0x39c   : > { %1702 = vmatprep.mubr.bf16.mxu1 %v2209_v41 }
 0x3a3   : > { %1703 = vmatmul.mubr.bf16.gmra.mrb[36].mxu1 %v2214_v42 }
 0x3a4   : > { %1706 = vmatprep.mubr.bf16.mxu1 %v2217_v43 }
 0x3ab   : > { %1707 = vmatmul.mubr.bf16.gmra.mrb[40].mxu1 %v2222_v44 }
 0x3ac   : > { %1710 = vmatprep.mubr.bf16.mxu1 %v2225_v45 }
 0x3b3   : > { %1711 = vmatmul.mubr.bf16.gmra.mrb[44].mxu1 %v2230_v48 }
 0x46e   : > { %v1700_v27 = vpop.f32.mrb[32].mxu1 }
 0x46f   : > { %v1333_v28 = vmul.f32 %v1700_v27, %v2275_v7  ;;  %v1268_v34 = vpop.f32.mrb[33].mxu1 }
 0x470   : > { %v1331_v35 = vmul.f32 %v1268_v34, %v2271_v3  ;;  %v1701_v40 = vpop.f32.mrb[34].mxu1 }
 0x471   : > { %1870 = vtanh.f32 %v1333_v28  ;;  %v1334_v41 = vmul.f32 %v1701_v40, %v2273_v4  ;;  %v1271_v42 = vpop.f32.mrb[35].mxu1 }
 0x472   : > { %1872 = vtanh.f32 %v1331_v35  ;;  %v1332_v43 = vmul.f32 %v1271_v42, %v2269_v2 }
 0x473   : > { %1874 = vtanh.f32 %v1334_v41 }
 0x474   : > { %1876 = vtanh.f32 %v1332_v43 }
 0x476   : > { %v1704_v44 = vpop.f32.mrb[36].mxu1 }
 0x477   : > { %v1337_v45 = vmul.f32 %v1704_v44, %v2283_v15  ;;  %v1284_v48 = vpop.f32.mrb[37].mxu1 }
 0x478   : > { %v1335_v7 = vmul.f32 %v1284_v48, %v2279_v9  ;;  %v1705_v3 = vpop.f32.mrb[38].mxu1 }
 0x479   : > { %1878 = vtanh.f32 %v1337_v45  ;;  %v1338_v32 = vmul.f32 %v1705_v3, %v2281_v11  ;;  %v1287_v4 = vpop.f32.mrb[39].mxu1 }
 0x47a   : > { %1880 = vtanh.f32 %v1335_v7  ;;  %v1336_v33 = vmul.f32 %v1287_v4, %v2277_v8 }
 0x47b   : > { %v1871_v2 = vpop.eup %1870  ;;  %1882 = vtanh.f32 %v1338_v32 }
 0x47c   : > { %v1873_v36 = vpop.eup %1872  ;;  %1365 = vst [vmem:[%s2383_s18 + $0x10] sm:$0xff] %v1871_v2  ;;  %1884 = vtanh.f32 %v1336_v33 }
 0x47d   : > { %v1875_v9 = vpop.eup %1874  ;;  %1363 = vst [vmem:[%s2383_s18] sm:$0xff] %v1873_v36 }
 0x47e   : > { %v1877_v15 = vpop.eup %1876  ;;  %1366 = vst [vmem:[%s2383_s18 + $0x18] sm:$0xff] %v1875_v9  ;;  %v1708_v11 = vpop.f32.mrb[40].mxu1 }
 0x47f   : > { %1364 = vst [vmem:[%s2383_s18 + $0x8] sm:$0xff] %v1877_v15  ;;  %v1341_v8 = vmul.f32 %v1708_v11, %v2300_v54  ;;  %v1300_v37 = vpop.f32.mrb[41].mxu1 }
 0x480   : > { %v1339_v62 = vmul.f32 %v1300_v37, %v2291_v30  ;;  %v1709_v61 = vpop.f32.mrb[42].mxu1 }
 0x481   : > { %1886 = vtanh.f32 %v1341_v8  ;;  %v1342_v38 = vmul.f32 %v1709_v61, %v2298_v50  ;;  %v1303_v39 = vpop.f32.mrb[43].mxu1 }
 0x482   : > { %1888 = vtanh.f32 %v1339_v62  ;;  %v1340_v49 = vmul.f32 %v1303_v39, %v2289_v29 }
 0x483   : > { %v1879_v51 = vpop.eup %1878  ;;  %1890 = vtanh.f32 %v1342_v38 }
 0x484   : > { %v1881_v55 = vpop.eup %1880  ;;  %1369 = vst [vmem:[%s2383_s18 + $0x30] sm:$0xff] %v1879_v51  ;;  %1892 = vtanh.f32 %v1340_v49 }
 0x485   : > { %v1883_v0 = vpop.eup %1882  ;;  %1367 = vst [vmem:[%s2383_s18 + $0x20] sm:$0xff] %v1881_v55 }
 0x486   : > { %v1885_v54 = vpop.eup %1884  ;;  %1370 = vst [vmem:[%s2383_s18 + $0x38] sm:$0xff] %v1883_v0  ;;  %v1712_v30 = vpop.f32.mrb[44].mxu1 }
 0x487   : > { %1368 = vst [vmem:[%s2383_s18 + $0x28] sm:$0xff] %v1885_v54  ;;  %v1345_v23 = vmul.f32 %v1712_v30, %v2314_v25  ;;  %v1316_v50 = vpop.f32.mrb[45].mxu1 }
 0x488   : > { %v1343_v6 = vmul.f32 %v1316_v50, %v2307_v10  ;;  %v1713_v29 = vpop.f32.mrb[46].mxu1 }
 0x489   : > { %1894 = vtanh.f32 %v1345_v23  ;;  %v1346_v5 = vmul.f32 %v1713_v29, %v2311_v22  ;;  %v1319_v56 = vpop.f32.mrb[47].mxu1 }
 0x48a   : > { %1896 = vtanh.f32 %v1343_v6  ;;  %v1344_v57 = vmul.f32 %v1319_v56, %v2303_v59 }
 0x48b   : > { %v1887_v58 = vpop.eup %1886  ;;  %1898 = vtanh.f32 %v1346_v5 }
 0x48c   : > { %v1889_v60 = vpop.eup %1888  ;;  %1373 = vst [vmem:[%s2383_s18 + $0x50] sm:$0xff] %v1887_v58  ;;  %1900 = vtanh.f32 %v1344_v57 }
 0x48d   : > { %v1891_v10 = vpop.eup %1890  ;;  %1371 = vst [vmem:[%s2383_s18 + $0x40] sm:$0xff] %v1889_v60 }
 0x48e   : > { %v1893_v25 = vpop.eup %1892  ;;  %1374 = vst [vmem:[%s2383_s18 + $0x58] sm:$0xff] %v1891_v10 }
 0x48f   : > { %1372 = vst [vmem:[%s2383_s18 + $0x48] sm:$0xff] %v1893_v25 }
 0x493   : > { %v1895_v22 = vpop.eup %1894 }
 0x494   : > { %v1897_v47 = vpop.eup %1896  ;;  %1377 = vst [vmem:[%s2383_s18 + $0x70] sm:$0xff] %v1895_v22 }
 0x495   : > { %v1899_v59 = vpop.eup %1898  ;;  %1375 = vst [vmem:[%s2383_s18 + $0x60] sm:$0xff] %v1897_v47 }
 0x496   : > { %v1901_v53 = vpop.eup %1900  ;;  %1378 = vst [vmem:[%s2383_s18 + $0x78] sm:$0xff] %v1899_v59 }
 0x497   : > { %1376 = vst [vmem:[%s2383_s18 + $0x68] sm:$0xff] %v1901_v53 }
 0x498   : > { %1915 = shalt.err (!%p1912_p3)
}
 0x499   : > { %s1916_s14 = scalar_lea.hbm %s2411_s29, 2048  ;;  %s1920_s16 = scalar_lea.hbm %s2467_s6, 8192 }
 0x49a   : > { %p1917_p4 = scmp.ne.s32.totalorder %s2411_s29, %s1916_s14  ;;  %p1921_p9 = scmp.lt.u32.totalorder %s2411_s29, %s2467_s6 }
 0x49b   : > { %p1922_p10 = scmp.lt.u32.totalorder %s1920_s16, %s1916_s14  ;;  %p1924_p12 = scmp.lt.u32.totalorder %s1916_s14, %s2411_s29 }
 0x49c   : > { %p1918_p7 = pnand %p1917_p4, %p2043_p5 }
 0x49d   : > { %p1923_p11 = por %p1922_p10, %p1921_p9 }
 0x49e   : > { %p1919_p8 = pneg %p1918_p7 }
 0x49f   : > { %p1925_p13 = por %p1924_p12, %p1923_p11 }
 0x4a1   : > { %p1926_p0 = pnand %p1925_p13, %p1919_p8 }
 0x4a3   : > { %1929 = shalt.err (!%p1926_p0)
}
 0x4a4   : > { %s1968_s19 = smov 128   ;;  %s1969_s10 = smov 8  }
 0x4a5   : > { %1714 = dma.vmem_to_hbm [thread:$0]  (%p2043_p5), %s2413_s26, 2048, %s2411_s29, %s2420_s25, %s1968_s19, %s1968_s19, %s1969_s10  }
 0x4a6 PF: > { %p1720_p1 = scmp.ge.s32.totalorder %s1964_s24, 2  ;;  %s1408_s28 = sand.u32 1, %s1952_s21  }
 0x4a7   : > { %s1409_s9 = scalar_lea.sflag [#allocation3], %s1408_s28 }
 0x4a8   : > { %p1717_p2 = pnand %p1720_p1, %p2047_p6 }
 0x4aa   : > { %1947 = dma.done.wait (!%p1717_p2), %s1409_s9, 2048  }
 0x4ab   : > { %1949 = vsyncadd (!%p1717_p2), %s1409_s9, 4294965248  ;;  %p16_p3 = scmp.ge.s32.totalorder %s2030_s27, 6   ;;  %s2470_s21 = smov %s1956_s22 }
 0x4ac   : > { %s2471_s22 = smov %s1960_s23  ;;  %s2472_s23 = smov %s2041_s30 }
 0x4ad   : > { %s2473_s24 = smov %s2030_s27  ;;  %18 = sbr.rel (!%p16_p3) target bundleno = 3 (0x3), region = 88 }
 0x4b4   :  { %1414 = vsyncpa [#allocation3], 1 }
 0x4b5   :  { %1416 = vsyncpa [#allocation3 + $0x1], 1 }

</bundles_post_ra>
